<compile_context>
chip_gen: v7x
topology: tpu7x:2x2x1
jax: 0.10.0
libtpu: 0.0.40
codegen_flags: <defaults>
</compile_context>

<pallas_src>
import functools

import jax
import jax.numpy as jnp
from jax.experimental import pallas as pl
from jax.experimental.pallas import tpu as pltpu


HIDDEN = 512
LANE = 128
SUBLANE = 8


def _round_up(n, m):
    return ((n + m - 1) // m) * m


def classifier2_kernel(x_ref, w1_ref, b1_ref, w2_ref, b2_ref, o_ref, h_ref):
    # h = relu(x @ W1 + b1): computed once per batch tile (first class tile)
    # and cached in VMEM scratch for the remaining class tiles of this row
    # block.  x/W1 are bf16, accumulate in f32, cache as bf16 for the MXU.
    @pl.when(pl.program_id(1) == 0)
    def _():
        h = jnp.dot(x_ref[...], w1_ref[...], preferred_element_type=jnp.float32)
        h_ref[...] = jnp.maximum(h + b1_ref[...], 0.0).astype(h_ref.dtype)

    # preds = relu(h @ W2 + b2)
    out = jnp.dot(h_ref[...], w2_ref[...], preferred_element_type=jnp.float32)
    o_ref[...] = jnp.maximum(out + b2_ref[...], 0.0).astype(o_ref.dtype)


@functools.partial(
    jax.jit,
    static_argnames=("num_classes", "block_b", "block_c", "out_dtype"))
def classifier2_forward(x, w1, b1, w2, b2, *, num_classes,
                        block_b=1024, block_c=2048, out_dtype=jnp.float32):
    """x: (B, 512) bf16 (f32 accepted, cast once).  w1: (512,512) bf16,
    b1: (1,512) f32, w2: (512, C_pad) bf16, b2: (1, C_pad) f32 (lane-padded,
    see prepare_params).  Returns (B, num_classes) out_dtype.

    out_dtype=jnp.bfloat16 halves output writeback if the consumer tolerates
    bf16 logits."""
    B, D = x.shape
    assert D == HIDDEN
    c_pad = w2.shape[1]
    assert c_pad % LANE == 0, "pad W2/b2 with prepare_params first"

    # MXU consumes bf16; ideally the producing layer already emits bf16 so
    # this cast is a no-op.
    if x.dtype != jnp.bfloat16:
        x = x.astype(jnp.bfloat16)

    # ---- batch tile --------------------------------------------------------
    tb = min(block_b, _round_up(B, SUBLANE))
    # v7x megacore: the "parallel" batch axis only helps when the grid has
    # >= 2 steps, so once the batch is worth splitting cap the tile at
    # ~ceil(B/2).  (No effect on single-TC v5e/v6e beyond 512-vs-1024 tiles,
    # which are within a couple % of each other.)
    if B >= 4 * SUBLANE:
        tb = min(tb, _round_up(-(-B // 2), SUBLANE))
    nb = (B + tb - 1) // tb

    # ---- class tile --------------------------------------------------------
    assert block_c % LANE == 0
    tc = min(block_c, c_pad)
    nc = (c_pad + tc - 1) // tc

    # ---- scoped VMEM budget (v5e default is only 16 MiB) -------------------
    out_itemsize = jnp.dtype(out_dtype).itemsize
    footprint = (2 * tb * HIDDEN * 2          # x tile, double-buffered, bf16
                 + 2 * tb * tc * out_itemsize  # out tile, double-buffered
                 + tb * HIDDEN * 2             # h scratch, bf16
                 + 2 * (HIDDEN * HIDDEN * 2    # W1 (resident, 2 bufs)
                        + HIDDEN * tc * 2      # W2 tile
                        + HIDDEN * 4 + tc * 4))  # biases
    vmem_limit = int(min(max(32 << 20, footprint + (8 << 20)), 112 << 20))

    cost = pl.CostEstimate(
        flops=2 * B * HIDDEN * (HIDDEN + c_pad),
        bytes_accessed=(B * HIDDEN * 2                 # x (bf16)
                        + HIDDEN * HIDDEN * 2          # W1
                        + HIDDEN * c_pad * 2           # W2
                        + (HIDDEN + c_pad) * 4         # biases
                        + B * c_pad * out_itemsize),   # output
        transcendentals=0,
    )

    # NOTE: the last batch block may be ragged (B % tb != 0).  Its OOB input
    # rows hold unspecified values, which is safe: the matmul is
    # row-independent and Pallas masks the OOB rows of the output store.
    out = pl.pallas_call(
        classifier2_kernel,
        out_shape=jax.ShapeDtypeStruct((B, c_pad), out_dtype),
        grid=(nb, nc),
        in_specs=[
            pl.BlockSpec((tb, D), lambda i, j: (i, 0)),      # x tile (pipelined)
            pl.BlockSpec((D, HIDDEN), lambda i, j: (0, 0)),  # W1 resident
            pl.BlockSpec((1, HIDDEN), lambda i, j: (0, 0)),  # b1 resident
            pl.BlockSpec((D, tc), lambda i, j: (0, j)),      # W2 (tiled over C)
            pl.BlockSpec((1, tc), lambda i, j: (0, j)),      # b2
        ],
        out_specs=pl.BlockSpec((tb, tc), lambda i, j: (i, j)),
        scratch_shapes=[pltpu.VMEM((tb, HIDDEN), jnp.bfloat16)],  # cached h
        compiler_params=pltpu.CompilerParams(
            dimension_semantics=("parallel", "arbitrary"),
            vmem_limit_bytes=vmem_limit,
        ),
        cost_estimate=cost,
    )(x, w1, b1, w2, b2)

    if c_pad != num_classes:
        out = out[:, :num_classes]
    return out


def init_params(key, num_classes, hidden=HIDDEN):
    """PyTorch nn.Linear default init: U(-1/sqrt(fan_in), 1/sqrt(fan_in)).
    Weights stored transposed as (in, out), f32."""
    k1, k2, k3, k4 = jax.random.split(key, 4)
    bound = 1.0 / jnp.sqrt(hidden)
    w1 = jax.random.uniform(k1, (hidden, hidden), jnp.float32, -bound, bound)
    b1 = jax.random.uniform(k2, (1, hidden), jnp.float32, -bound, bound)
    w2 = jax.random.uniform(k3, (hidden, num_classes), jnp.float32, -bound, bound)
    b2 = jax.random.uniform(k4, (1, num_classes), jnp.float32, -bound, bound)
    return w1, b1, w2, b2


def prepare_params(w1, b1, w2, b2):
    """One-time prep: weights -> bf16, class dim zero-padded to a multiple of
    128 lanes (lane-dense second matmul / stores).  Biases stay f32."""
    num_classes = w2.shape[1]
    c_pad = _round_up(num_classes, LANE)
    w2p = jnp.pad(w2, ((0, 0), (0, c_pad - num_classes)))
    b2p = jnp.pad(b2, ((0, 0), (0, c_pad - num_classes)))
    return (w1.astype(jnp.bfloat16), b1.astype(jnp.float32),
            w2p.astype(jnp.bfloat16), b2p.astype(jnp.float32))


def reference_forward_bf16(x_bf16, w1_bf16, b1, w2_bf16, b2):
    """Same numerics as the kernel (bf16 matmul inputs, f32 accumulate,
    bf16 re-round of the hidden activation)."""
    h = jnp.dot(x_bf16, w1_bf16, preferred_element_type=jnp.float32)
    h = jnp.maximum(h + b1, 0.0).astype(jnp.bfloat16)
    o = jnp.dot(h, w2_bf16, preferred_element_type=jnp.float32)
    return jnp.maximum(o + b2, 0.0)


def reference_forward_f32(x, w1, b1, w2, b2):
    h = jnp.maximum(x @ w1 + b1, 0.0)
    return jnp.maximum(h @ w2 + b2, 0.0)


def _check(batch, num_classes, *, block_b, block_c, key):
    kx, kp = jax.random.split(key)
    x = jax.random.normal(kx, (batch, HIDDEN), jnp.float32)
    w1, b1, w2, b2 = init_params(kp, num_classes)
    w1p, b1p, w2p, b2p = prepare_params(w1, b1, w2, b2)

    # Producer emits bf16 activations (see perf notes); wrapper would cast
    # anyway if handed f32.
    x_bf16 = x.astype(jnp.bfloat16)

    out = classifier2_forward(x_bf16, w1p, b1p, w2p, b2p,
                              num_classes=num_classes,
                              block_b=block_b, block_c=block_c)
    out = jax.block_until_ready(out)
    assert out.shape == (batch, num_classes)
    assert out.dtype == jnp.float32

    # Exact-precision reference (same bf16 matmul inputs / f32 accumulate).
    ref = reference_forward_bf16(x_bf16, w1p, b1p, w2p, b2p)[:, :num_classes]
    assert jnp.allclose(out, ref, atol=1e-2, rtol=1e-2), "mismatch vs bf16 ref"

    # Loose sanity check against the full-f32 PyTorch-equivalent math.
    ref32 = reference_forward_f32(x, w1, b1, w2, b2)
    assert jnp.allclose(out, ref32, atol=1e-1, rtol=1e-1), "mismatch vs f32 ref"


if __name__ == "__main__":
    key = jax.random.PRNGKey(0)
    k1, k2 = jax.random.split(key)

    # Small default config: single batch tile, single class tile.
    _check(batch=8, num_classes=10, block_b=1024, block_c=2048, key=k1)

    # Exercise multi-step batch grid (ragged last block), the megacore tile
    # cap, and the class-tiled path with the cached-h scratch.
    _check(batch=50, num_classes=300, block_b=16, block_c=128, key=k2)

    # TODO(synk): self.drop / args.dropout_classifier is never used in the
    # module's forward(), so no dropout path is implemented here.

    print("KERNEL_OK")
</pallas_src>

<mosaic_0001>
module attributes {stable_mosaic.version = 11 : i64} {
  func.func @classifier2_kernel(%arg0: i32, %arg1: i32, %arg2: memref<8x512xbf16, #tpu.memory_space<vmem>>, %arg3: memref<512x512xbf16, #tpu.memory_space<vmem>>, %arg4: memref<1x512xf32, #tpu.memory_space<vmem>>, %arg5: memref<512x128xbf16, #tpu.memory_space<vmem>>, %arg6: memref<1x128xf32, #tpu.memory_space<vmem>>, %arg7: memref<8x128xf32, #tpu.memory_space<vmem>>, %arg8: memref<8x512xbf16, #tpu.memory_space<vmem>>) attributes {dimension_semantics = [#tpu.dimension_semantics<parallel>, #tpu.dimension_semantics<arbitrary>], iteration_bounds = array<i64: 1, 1>, scalar_prefetch = 0 : i64, scratch_operands = 1 : i64, tpu.core_type = #tpu.core_type<tc>, window_params = [{transform_indices = @transform_0, window_bounds = array<i64: 8, 512>}, {pipeline_mode = #tpu.pipeline_mode<synchronous>, transform_indices = @transform_1, window_bounds = array<i64: 512, 512>}, {pipeline_mode = #tpu.pipeline_mode<synchronous>, transform_indices = @transform_2, window_bounds = array<i64: 1, 512>}, {transform_indices = @transform_3, window_bounds = array<i64: 512, 128>}, {transform_indices = @transform_4, window_bounds = array<i64: 1, 128>}, {transform_indices = @transform_5, window_bounds = array<i64: 8, 128>}]} {
    %c0_i32 = arith.constant 0 : i32
    %0 = arith.cmpi eq, %arg1, %c0_i32 : i32
    %1 = arith.extui %0 : i1 to i32
    %c0_i32_0 = arith.constant 0 : i32
    %2 = arith.cmpi ne, %1, %c0_i32_0 : i32
    scf.if %2 {
      %c0_9 = arith.constant 0 : index
      %c0_10 = arith.constant 0 : index
      %12 = vector.load %arg2[%c0_9, %c0_10] : memref<8x512xbf16, #tpu.memory_space<vmem>>, vector<8x512xbf16>
      %c0_11 = arith.constant 0 : index
      %c0_12 = arith.constant 0 : index
      %13 = vector.load %arg3[%c0_11, %c0_12] : memref<512x512xbf16, #tpu.memory_space<vmem>>, vector<512x512xbf16>
      %cst_13 = arith.constant dense<0.000000e+00> : vector<8x512xf32>
      %14 = tpu.matmul %12, %13, %cst_13 {dimension_numbers = #tpu.dot_dimension_numbers<[1], [0], [0], [1], [0, 0, 1, 1], [], []>} : vector<8x512xbf16>, vector<512x512xbf16>, vector<8x512xf32> -> vector<8x512xf32>
      %c0_14 = arith.constant 0 : index
      %c0_15 = arith.constant 0 : index
      %15 = vector.load %arg4[%c0_14, %c0_15] : memref<1x512xf32, #tpu.memory_space<vmem>>, vector<1x512xf32>
      %16 = vector.broadcast %15 : vector<1x512xf32> to vector<8x512xf32>
      %17 = arith.addf %14, %16 : vector<8x512xf32>
      %cst_16 = arith.constant 0.000000e+00 : f32
      %18 = vector.broadcast %cst_16 : f32 to vector<8x512xf32>
      %19 = arith.maximumf %17, %18 : vector<8x512xf32>
      %20 = arith.truncf %19 : vector<8x512xf32> to vector<8x512xbf16>
      %c0_17 = arith.constant 0 : index
      %c0_18 = arith.constant 0 : index
      %21 = vector.load %arg8[%c0_17, %c0_18] : memref<8x512xbf16, #tpu.memory_space<vmem>>, vector<8x512xbf16>
      tpu.vector_store %arg8[%c0_17, %c0_18], %20 {strides = array<i32>} : memref<8x512xbf16, #tpu.memory_space<vmem>>, vector<8x512xbf16>,
    } else {
    }
    %c0 = arith.constant 0 : index
    %c0_1 = arith.constant 0 : index
    %3 = vector.load %arg8[%c0, %c0_1] : memref<8x512xbf16, #tpu.memory_space<vmem>>, vector<8x512xbf16>
    %c0_2 = arith.constant 0 : index
    %c0_3 = arith.constant 0 : index
    %4 = vector.load %arg5[%c0_2, %c0_3] : memref<512x128xbf16, #tpu.memory_space<vmem>>, vector<512x128xbf16>
    %cst = arith.constant dense<0.000000e+00> : vector<8x128xf32>
    %5 = tpu.matmul %3, %4, %cst {dimension_numbers = #tpu.dot_dimension_numbers<[1], [0], [0], [1], [0, 0, 1, 1], [], []>} : vector<8x512xbf16>, vector<512x128xbf16>, vector<8x128xf32> -> vector<8x128xf32>
    %c0_4 = arith.constant 0 : index
    %c0_5 = arith.constant 0 : index
    %6 = vector.load %arg6[%c0_4, %c0_5] : memref<1x128xf32, #tpu.memory_space<vmem>>, vector<1x128xf32>
    %7 = vector.broadcast %6 : vector<1x128xf32> to vector<8x128xf32>
    %8 = arith.addf %5, %7 : vector<8x128xf32>
    %cst_6 = arith.constant 0.000000e+00 : f32
    %9 = vector.broadcast %cst_6 : f32 to vector<8x128xf32>
    %10 = arith.maximumf %8, %9 : vector<8x128xf32>
    %c0_7 = arith.constant 0 : index
    %c0_8 = arith.constant 0 : index
    %11 = vector.load %arg7[%c0_7, %c0_8] : memref<8x128xf32, #tpu.memory_space<vmem>>, vector<8x128xf32>
    tpu.vector_store %arg7[%c0_7, %c0_8], %10 {strides = array<i32>} : memref<8x128xf32, #tpu.memory_space<vmem>>, vector<8x128xf32>,
    return
  }
  func.func @transform_0(%arg0: i32, %arg1: i32) -> (i32, i32) {
    %c0_i32 = arith.constant 0 : i32
    %c0_i32_0 = arith.constant 0 : i32
    return %arg0, %c0_i32 : i32, i32
  }
  func.func @transform_1(%arg0: i32, %arg1: i32) -> (i32, i32) {
    %c0_i32 = arith.constant 0 : i32
    %c0_i32_0 = arith.constant 0 : i32
    %c0_i32_1 = arith.constant 0 : i32
    return %c0_i32, %c0_i32_0 : i32, i32
  }
  func.func @transform_2(%arg0: i32, %arg1: i32) -> (i32, i32) {
    %c0_i32 = arith.constant 0 : i32
    %c0_i32_0 = arith.constant 0 : i32
    %c0_i32_1 = arith.constant 0 : i32
    return %c0_i32, %c0_i32_0 : i32, i32
  }
  func.func @transform_3(%arg0: i32, %arg1: i32) -> (i32, i32) {
    %c0_i32 = arith.constant 0 : i32
    %c0_i32_0 = arith.constant 0 : i32
    return %c0_i32, %arg1 : i32, i32
  }
  func.func @transform_4(%arg0: i32, %arg1: i32) -> (i32, i32) {
    %c0_i32 = arith.constant 0 : i32
    %c0_i32_0 = arith.constant 0 : i32
    return %c0_i32, %arg1 : i32, i32
  }
  func.func @transform_5(%arg0: i32, %arg1: i32) -> (i32, i32) {
    %c0_i32 = arith.constant 0 : i32
    return %arg0, %arg1 : i32, i32
  }
}

</mosaic_0001>

<bundles_post_ra>
// kernel: classifier2_forward.1
= control target key start
LH: loop header
LB: loop body
LE: loop exit
PB: predicated region body
PF: predicated region fallthrough
CT: control target
= control target key end

     0   :  { %10 = vsyncpa [#allocation4], 0  ;;  %s2095_s0 = inlined_call_operand.hbm [shape: bf16[8,512], index: 0, kind: input, shape index: {}]   ;;  %s2096_s1 = inlined_call_operand.hbm [shape: bf16[512,512], index: 1, kind: input, shape index: {}]   ;;  %s2097_s2 = inlined_call_operand.vmem [shape: f32[1,512], index: 2, kind: input, shape index: {}]   ;;  %s2098_s3 = inlined_call_operand.hbm [shape: bf16[512,128], index: 3, kind: input, shape index: {}]   ;;  %s2099_s4 = inlined_call_operand.vmem [shape: f32[1,128], index: 4, kind: input, shape index: {}]   ;;  %s2100_s5 = inlined_call_operand.hbm [shape: f32[8,128], index: 5, kind: output, shape index: {}]  }
   0x1   :  { %11 = vsyncpa [#allocation7], 0 }
   0x2   :  { %12 = vsyncpa [#allocation5], 0  ;;  %s1997_s18 = smov [#allocation6]   ;;  %s1903_s22 = scalar_lea.hbm %s2096_s1, 16384 }
   0x3   :  { %s28_s19 = sshll.u32 %s1997_s18, 4  ;;  %p1904_p0 = scmp.ne.s32.totalorder %s2096_s1, %s1903_s22  ;;  %s29_s19 = int_to_ptr.vmem [resolvable:$true] %s28_s19 }
   0x4   :  { %p1907_p1 = scmp.lt.u32.totalorder %s1903_s22, %s2096_s1 }
   0x6   :  { %p1909_p2 = pnand %p1907_p1, %p1904_p0 }
   0x8   :  { %1912 = shalt.err (!%p1909_p2)
}
   0x9   :  { %s1913_s27 = scalar_lea.vmem %s29_s19, 16384  ;;  %p1918_p4 = scmp.lt.s32.totalorder %s29_s19, %s29_s19 }
   0xa   :  { %p1914_p3 = scmp.ne.s32.totalorder %s29_s19, %s1913_s27  ;;  %p1919_p5 = scmp.lt.s32.totalorder %s1913_s27, %s1913_s27 }
   0xc   :  { %p1920_p6 = por %p1919_p5, %p1918_p4 }
   0xe   :  { %p1921_p7 = pnand %p1920_p6, %p1914_p3 }
  0x10   :  { %1924 = shalt.err (!%p1921_p7)
}
  0x11   :  { %s1998_s28 = smov 256   ;;  %s1999_s29 = smov 16  }
  0x12   :  { %34 = dma.hbm_to_vmem [thread:$0]  %s2096_s1, 16384, %s29_s19, [#allocation7], %s1998_s28, %s1998_s28, %s1999_s29  }
  0x13   :  { %s2000_s7 = smov [#allocation3]   ;;  %s2001_s9 = smov [#allocation8]  }
  0x14   :  { %s19_s8 = sshll.u32 %s2000_s7, 4  ;;  %s42_s10 = sshll.u32 %s2001_s9, 4  ;;  %s20_s8 = int_to_ptr.vmem [resolvable:$true] %s19_s8  ;;  %s43_s10 = int_to_ptr.vmem [resolvable:$true] %s42_s10 }
  0x15   :  { %s1925_s13 = scalar_lea.hbm %s2095_s0, 256 }
  0x16   :  { %p1926_p8 = scmp.ne.s32.totalorder %s2095_s0, %s1925_s13  ;;  %p1929_p9 = scmp.lt.u32.totalorder %s1925_s13, %s2095_s0 }
  0x18   :  { %p1931_p10 = pnand %p1929_p9, %p1926_p8 }
  0x1a   :  { %1934 = shalt.err (!%p1931_p10)
}
  0x1b   :  { %s1935_s1 = scalar_lea.vmem %s20_s8, 256  ;;  %p1940_p12 = scmp.lt.s32.totalorder %s20_s8, %s20_s8 }
  0x1c   :  { %p1936_p11 = scmp.ne.s32.totalorder %s20_s8, %s1935_s1  ;;  %p1941_p13 = scmp.lt.s32.totalorder %s1935_s1, %s1935_s1 }
  0x1e   :  { %p1942_p0 = por %p1941_p13, %p1940_p12 }
  0x20   :  { %p1943_p1 = pnand %p1942_p0, %p1936_p11 }
  0x22   :  { %1946 = shalt.err (!%p1943_p1)
}
  0x23   :  { %22 = dma.hbm_to_vmem [thread:$0]  %s2095_s0, 256, %s20_s8, [#allocation4]  }
  0x24   :  { %s1947_s22 = scalar_lea.hbm %s2098_s3, 4096 }
  0x25   :  { %p1948_p2 = scmp.ne.s32.totalorder %s2098_s3, %s1947_s22  ;;  %p1951_p3 = scmp.lt.u32.totalorder %s1947_s22, %s2098_s3 }
  0x27   :  { %p1953_p4 = pnand %p1951_p3, %p1948_p2 }
  0x29   :  { %1956 = shalt.err (!%p1953_p4)
}
  0x2a   :  { %s1957_s27 = scalar_lea.vmem %s43_s10, 4096  ;;  %p1962_p6 = scmp.lt.s32.totalorder %s43_s10, %s43_s10 }
  0x2b   :  { %p1958_p5 = scmp.ne.s32.totalorder %s43_s10, %s1957_s27  ;;  %p1963_p7 = scmp.lt.s32.totalorder %s1957_s27, %s1957_s27 }
  0x2d   :  { %p1964_p8 = por %p1963_p7, %p1962_p6 }
  0x2f   :  { %p1965_p9 = pnand %p1964_p8, %p1958_p5 }
  0x31   :  { %1968 = shalt.err (!%p1965_p9)
}
  0x32   :  { %s2002_s0 = smov 64   ;;  %s2003_s28 = smov 4  }
  0x33   :  { %48 = dma.hbm_to_vmem [thread:$0]  %s2098_s3, 4096, %s43_s10, [#allocation7], %s2002_s0, %s2002_s0, %s2003_s28  }
  0x34   :  { %1991 = dma.done.wait [#allocation4], 256  }
  0x35   :  { %1992 = vsyncadd [#allocation4], 4294967040 }
  0x36   :  { %1993 = dma.done.wait [#allocation7], 20480  }
  0x37   :  { %1994 = vsyncadd [#allocation7], 4294946816  ;;  %v1675_v0 = vld [vmem:[#allocation6 + $0x4] ss:$16 sps:$4 sm:$0xff]   ;;  %v1677_v1 = vld [vmem:[#allocation6 + $0xc] ss:$16 sps:$4 sm:$0xff]  }
  0x38   :  { %871 = vmatprep.subr.bf16.mxu0 %v1675_v0  ;;  %v1679_v2 = vld [vmem:[#allocation6] ss:$16 sps:$4 sm:$0xff]   ;;  %v1680_v3 = vld [vmem:[#allocation6 + $0x8] ss:$16 sps:$4 sm:$0xff]   ;;  %953 = vmatprep.subr.bf16.mxu1 %v1677_v1  ;;  %v1681_v4 = vld [vmem:[#allocation6 + $0x24] ss:$16 sps:$4 sm:$0xff]  }
  0x39   :  { %872 = vmatpush1.bf16.msra.mxu0 %v1679_v2  ;;  %954 = vmatpush1.bf16.msra.mxu1 %v1680_v3  ;;  %v1683_v5 = vld [vmem:[#allocation6 + $0x2c] ss:$16 sps:$4 sm:$0xff]   ;;  %v1685_v6 = vld [vmem:[#allocation6 + $0x20] ss:$16 sps:$4 sm:$0xff]   ;;  %v1686_v7 = vld [vmem:[#allocation6 + $0x28] ss:$16 sps:$4 sm:$0xff]  }
  0x3a   :  { %873 = vmatprep.subr.bf16.mxu0 %v1681_v4  ;;  %955 = vmatprep.subr.bf16.mxu1 %v1683_v5  ;;  %v1687_v8 = vld [vmem:[#allocation6 + $0x44] ss:$16 sps:$4 sm:$0xff]   ;;  %v1689_v9 = vld [vmem:[#allocation6 + $0x4c] ss:$16 sps:$4 sm:$0xff]   ;;  %v1691_v10 = vld [vmem:[#allocation6 + $0x40] ss:$16 sps:$4 sm:$0xff]  }
  0x3b   :  { %v1692_v11 = vld [vmem:[#allocation6 + $0x48] ss:$16 sps:$4 sm:$0xff]   ;;  %v1693_v12 = vld [vmem:[#allocation6 + $0x64] ss:$16 sps:$4 sm:$0xff]   ;;  %v1695_v13 = vld [vmem:[#allocation6 + $0x6c] ss:$16 sps:$4 sm:$0xff]  }
  0x3c   :  { %v1697_v14 = vld [vmem:[#allocation6 + $0x60] ss:$16 sps:$4 sm:$0xff]   ;;  %v1698_v15 = vld [vmem:[#allocation6 + $0x68] ss:$16 sps:$4 sm:$0xff]   ;;  %v1699_v16 = vld [vmem:[#allocation6 + $0x84] ss:$16 sps:$4 sm:$0xff]  }
  0x3d   :  { %874 = vmatpush1.bf16.msra.mxu0 %v1685_v6  ;;  %956 = vmatpush1.bf16.msra.mxu1 %v1686_v7  ;;  %v1701_v17 = vld [vmem:[#allocation6 + $0x8c] ss:$16 sps:$4 sm:$0xff]   ;;  %v1703_v18 = vld [vmem:[#allocation6 + $0x80] ss:$16 sps:$4 sm:$0xff]   ;;  %v1704_v19 = vld [vmem:[#allocation6 + $0x88] ss:$16 sps:$4 sm:$0xff]  }
  0x3e   :  { %875 = vmatprep.subr.bf16.mxu0 %v1687_v8  ;;  %957 = vmatprep.subr.bf16.mxu1 %v1689_v9  ;;  %v1705_v20 = vld [vmem:[#allocation6 + $0xa4] ss:$16 sps:$4 sm:$0xff]   ;;  %v1707_v21 = vld [vmem:[#allocation6 + $0xac] ss:$16 sps:$4 sm:$0xff]   ;;  %v1709_v22 = vld [vmem:[#allocation6 + $0xa0] ss:$16 sps:$4 sm:$0xff]  }
  0x3f   :  { %v1710_v23 = vld [vmem:[#allocation6 + $0xa8] ss:$16 sps:$4 sm:$0xff]   ;;  %v1711_v24 = vld [vmem:[#allocation6 + $0xc4] ss:$16 sps:$4 sm:$0xff]   ;;  %v1713_v25 = vld [vmem:[#allocation6 + $0xcc] ss:$16 sps:$4 sm:$0xff]  }
  0x40   :  { %v1715_v26 = vld [vmem:[#allocation6 + $0xc0] ss:$16 sps:$4 sm:$0xff]   ;;  %v1716_v27 = vld [vmem:[#allocation6 + $0xc8] ss:$16 sps:$4 sm:$0xff]   ;;  %v1717_v28 = vld [vmem:[#allocation6 + $0xe4] ss:$16 sps:$4 sm:$0xff]  }
  0x41   :  { %876 = vmatpush1.bf16.msra.mxu0 %v1691_v10  ;;  %958 = vmatpush1.bf16.msra.mxu1 %v1692_v11  ;;  %v1719_v29 = vld [vmem:[#allocation6 + $0xec] ss:$16 sps:$4 sm:$0xff]   ;;  %v1721_v30 = vld [vmem:[#allocation6 + $0xe0] ss:$16 sps:$4 sm:$0xff]   ;;  %v1722_v31 = vld [vmem:[#allocation6 + $0xe8] ss:$16 sps:$4 sm:$0xff]  }
  0x42   :  { %877 = vmatprep.subr.bf16.mxu0 %v1693_v12  ;;  %959 = vmatprep.subr.bf16.mxu1 %v1695_v13  ;;  %v1723_v32 = vld [vmem:[#allocation6 + $0x104] ss:$16 sps:$4 sm:$0xff]   ;;  %v1725_v33 = vld [vmem:[#allocation6 + $0x10c] ss:$16 sps:$4 sm:$0xff]   ;;  %v1727_v34 = vld [vmem:[#allocation6 + $0x100] ss:$16 sps:$4 sm:$0xff]  }
  0x43   :  { %v1728_v35 = vld [vmem:[#allocation6 + $0x108] ss:$16 sps:$4 sm:$0xff]   ;;  %v1729_v36 = vld [vmem:[#allocation6 + $0x124] ss:$16 sps:$4 sm:$0xff]   ;;  %v1731_v37 = vld [vmem:[#allocation6 + $0x12c] ss:$16 sps:$4 sm:$0xff]  }
  0x44   :  { %v1733_v38 = vld [vmem:[#allocation6 + $0x120] ss:$16 sps:$4 sm:$0xff]   ;;  %v1734_v39 = vld [vmem:[#allocation6 + $0x128] ss:$16 sps:$4 sm:$0xff]   ;;  %v1735_v40 = vld [vmem:[#allocation6 + $0x144] ss:$16 sps:$4 sm:$0xff]  }
  0x45   :  { %878 = vmatpush1.bf16.msra.mxu0 %v1697_v14  ;;  %960 = vmatpush1.bf16.msra.mxu1 %v1698_v15  ;;  %v1737_v41 = vld [vmem:[#allocation6 + $0x14c] ss:$16 sps:$4 sm:$0xff]   ;;  %v1739_v42 = vld [vmem:[#allocation6 + $0x140] ss:$16 sps:$4 sm:$0xff]   ;;  %v1740_v43 = vld [vmem:[#allocation6 + $0x148] ss:$16 sps:$4 sm:$0xff]  }
  0x46   :  { %879 = vmatprep.subr.bf16.mxu0 %v1699_v16  ;;  %961 = vmatprep.subr.bf16.mxu1 %v1701_v17  ;;  %v1741_v44 = vld [vmem:[#allocation6 + $0x164] ss:$16 sps:$4 sm:$0xff]   ;;  %v1743_v45 = vld [vmem:[#allocation6 + $0x16c] ss:$16 sps:$4 sm:$0xff]   ;;  %v1745_v47 = vld [vmem:[#allocation6 + $0x160] ss:$16 sps:$4 sm:$0xff]  }
  0x47   :  { %v65_v46 = vld [vmem:[#allocation3] sm:$0xff]  ;;  %v1746_v49 = vld [vmem:[#allocation6 + $0x168] ss:$16 sps:$4 sm:$0xff]   ;;  %v1749_v51 = vld [vmem:[#allocation6 + $0x18c] ss:$16 sps:$4 sm:$0xff]   ;;  %s2004_s8 = smov [#allocation9]  }
  0x48   :  { %v1435_v48 = vcombine.high %v65_v46, %v65_v46  ;;  %v1747_v50 = vld [vmem:[#allocation6 + $0x184] ss:$16 sps:$4 sm:$0xff]   ;;  %v1751_v52 = vld [vmem:[#allocation6 + $0x180] ss:$16 sps:$4 sm:$0xff]   ;;  %v1752_v53 = vld [vmem:[#allocation6 + $0x188] ss:$16 sps:$4 sm:$0xff]   ;;  %v1434_v4 = vcombine.low %v65_v46, %v65_v46 }
  0x49   :  { %880 = vmatpush1.bf16.msra.mxu0 %v1703_v18  ;;  %962 = vmatpush1.bf16.msra.mxu1 %v1704_v19  ;;  %v1753_v54 = vld [vmem:[#allocation6 + $0x1a4] ss:$16 sps:$4 sm:$0xff]   ;;  %v1755_v55 = vld [vmem:[#allocation6 + $0x1ac] ss:$16 sps:$4 sm:$0xff]   ;;  %v1757_v56 = vld [vmem:[#allocation6 + $0x1a0] ss:$16 sps:$4 sm:$0xff]  }
  0x4a   :  { %881 = vmatprep.subr.bf16.mxu0 %v1705_v20  ;;  %963 = vmatprep.subr.bf16.mxu1 %v1707_v21  ;;  %v1758_v57 = vld [vmem:[#allocation6 + $0x1a8] ss:$16 sps:$4 sm:$0xff]   ;;  %v1759_v58 = vld [vmem:[#allocation6 + $0x1c4] ss:$16 sps:$4 sm:$0xff]   ;;  %v1761_v59 = vld [vmem:[#allocation6 + $0x1cc] ss:$16 sps:$4 sm:$0xff]  }
  0x4b   :  { %903 = vmatprep.mubr.bf16.mxu0 %v1435_v48  ;;  %985 = vmatprep.mubr.bf16.mxu1 %v1435_v48  ;;  %v1763_v60 = vld [vmem:[#allocation6 + $0x1c0] ss:$16 sps:$4 sm:$0xff]   ;;  %v1764_v61 = vld [vmem:[#allocation6 + $0x1c8] ss:$16 sps:$4 sm:$0xff]   ;;  %v1765_v62 = vld [vmem:[#allocation6 + $0x1e4] ss:$16 sps:$4 sm:$0xff]  }
  0x4c   :  { %v1767_v63 = vld [vmem:[#allocation6 + $0x1ec] ss:$16 sps:$4 sm:$0xff]   ;;  %v1769_v0 = vld [vmem:[#allocation6 + $0x1e0] ss:$16 sps:$4 sm:$0xff]   ;;  %v1770_v1 = vld [vmem:[#allocation6 + $0x1e8] ss:$16 sps:$4 sm:$0xff]  }
  0x4d   :  { %882 = vmatpush1.bf16.msra.mxu0 %v1709_v22  ;;  %964 = vmatpush1.bf16.msra.mxu1 %v1710_v23  ;;  %v1775_v2 = vld [vmem:[#allocation6 + $0x204] ss:$16 sps:$4 sm:$0xff]   ;;  %v1778_v3 = vld [vmem:[#allocation6 + $0x20c] ss:$16 sps:$4 sm:$0xff]   ;;  %v1773_v5 = vld [vmem:[#allocation6 + $0x200] ss:$16 sps:$4 sm:$0xff]  }
  0x4e   :  { %883 = vmatprep.subr.bf16.mxu0 %v1711_v24  ;;  %965 = vmatprep.subr.bf16.mxu1 %v1713_v25  ;;  %v1776_v6 = vld [vmem:[#allocation6 + $0x208] ss:$16 sps:$4 sm:$0xff]   ;;  %v1781_v7 = vld [vmem:[#allocation6 + $0x224] ss:$16 sps:$4 sm:$0xff]   ;;  %v1784_v8 = vld [vmem:[#allocation6 + $0x22c] ss:$16 sps:$4 sm:$0xff]  }
  0x4f   :  { %v1779_v9 = vld [vmem:[#allocation6 + $0x220] ss:$16 sps:$4 sm:$0xff]   ;;  %v1782_v10 = vld [vmem:[#allocation6 + $0x228] ss:$16 sps:$4 sm:$0xff]   ;;  %v1787_v11 = vld [vmem:[#allocation6 + $0x244] ss:$16 sps:$4 sm:$0xff]  }
  0x50   :  { %v1790_v12 = vld [vmem:[#allocation6 + $0x24c] ss:$16 sps:$4 sm:$0xff]   ;;  %v1785_v13 = vld [vmem:[#allocation6 + $0x240] ss:$16 sps:$4 sm:$0xff]   ;;  %v1788_v14 = vld [vmem:[#allocation6 + $0x248] ss:$16 sps:$4 sm:$0xff]  }
  0x51   :  { %884 = vmatpush1.bf16.msra.mxu0 %v1715_v26  ;;  %966 = vmatpush1.bf16.msra.mxu1 %v1716_v27  ;;  %v1793_v15 = vld [vmem:[#allocation6 + $0x264] ss:$16 sps:$4 sm:$0xff]   ;;  %v1796_v16 = vld [vmem:[#allocation6 + $0x26c] ss:$16 sps:$4 sm:$0xff]   ;;  %v1791_v17 = vld [vmem:[#allocation6 + $0x260] ss:$16 sps:$4 sm:$0xff]  }
  0x52   :  { %885 = vmatprep.subr.bf16.mxu0 %v1717_v28  ;;  %967 = vmatprep.subr.bf16.mxu1 %v1719_v29  ;;  %v1794_v18 = vld [vmem:[#allocation6 + $0x268] ss:$16 sps:$4 sm:$0xff]   ;;  %v1799_v19 = vld [vmem:[#allocation6 + $0x284] ss:$16 sps:$4 sm:$0xff]   ;;  %v1802_v20 = vld [vmem:[#allocation6 + $0x28c] ss:$16 sps:$4 sm:$0xff]  }
  0x53   :  { %v1797_v21 = vld [vmem:[#allocation6 + $0x280] ss:$16 sps:$4 sm:$0xff]   ;;  %v1800_v22 = vld [vmem:[#allocation6 + $0x288] ss:$16 sps:$4 sm:$0xff]   ;;  %v1805_v23 = vld [vmem:[#allocation6 + $0x2a4] ss:$16 sps:$4 sm:$0xff]  }
  0x54   :  { %v1808_v24 = vld [vmem:[#allocation6 + $0x2ac] ss:$16 sps:$4 sm:$0xff]   ;;  %v1803_v25 = vld [vmem:[#allocation6 + $0x2a0] ss:$16 sps:$4 sm:$0xff]   ;;  %v1806_v26 = vld [vmem:[#allocation6 + $0x2a8] ss:$16 sps:$4 sm:$0xff]  }
  0x55   :  { %886 = vmatpush1.bf16.msra.mxu0 %v1721_v30  ;;  %968 = vmatpush1.bf16.msra.mxu1 %v1722_v31  ;;  %v1811_v27 = vld [vmem:[#allocation6 + $0x2c4] ss:$16 sps:$4 sm:$0xff]   ;;  %v1814_v28 = vld [vmem:[#allocation6 + $0x2cc] ss:$16 sps:$4 sm:$0xff]   ;;  %v1809_v30 = vld [vmem:[#allocation6 + $0x2c0] ss:$16 sps:$4 sm:$0xff]  }
  0x56   :  { %887 = vmatprep.subr.bf16.mxu0 %v1723_v32  ;;  %969 = vmatprep.subr.bf16.mxu1 %v1725_v33  ;;  %v2071_v29 = vld [vmem:[#allocation3 + $0x8] sm:$0xff]  ;;  %v1817_v33 = vld [vmem:[#allocation6 + $0x2e4] ss:$16 sps:$4 sm:$0xff]   ;;  %s1424_s9 = sshll.u32 %s2004_s8, 4  ;;  %s1425_s9 = int_to_ptr.vmem [resolvable:$true] %s1424_s9 }
  0x57   :  { %v1437_v31 = vcombine.high %v2071_v29, %v2071_v29  ;;  %v1812_v32 = vld [vmem:[#allocation6 + $0x2c8] ss:$16 sps:$4 sm:$0xff]   ;;  %v1838_v46 = vld [vmem:[#allocation6 + $0x34c] ss:$16 sps:$4 sm:$0xff]   ;;  %s1969_s10 = scalar_lea.vmem %s1425_s9, 128  ;;  %p1974_p11 = scmp.lt.s32.totalorder %s1425_s9, %s1425_s9 }
  0x58   :  { %v1836_v48 = vld [vmem:[#allocation6 + $0x348] ss:$16 sps:$4 sm:$0xff]   ;;  %p1970_p10 = scmp.ne.s32.totalorder %s1425_s9, %s1969_s10  ;;  %p1975_p12 = scmp.lt.s32.totalorder %s1969_s10, %s1969_s10 }
  0x59   :  { %888 = vmatpush1.bf16.msra.mxu0 %v1727_v34  ;;  %970 = vmatpush1.bf16.msra.mxu1 %v1728_v35  ;;  %v1820_v34 = vld [vmem:[#allocation6 + $0x2ec] ss:$16 sps:$4 sm:$0xff]   ;;  %v1815_v35 = vld [vmem:[#allocation6 + $0x2e0] ss:$16 sps:$4 sm:$0xff]  }
  0x5a   :  { %889 = vmatprep.subr.bf16.mxu0 %v1729_v36  ;;  %971 = vmatprep.subr.bf16.mxu1 %v1731_v37  ;;  %v1818_v36 = vld [vmem:[#allocation6 + $0x2e8] ss:$16 sps:$4 sm:$0xff]   ;;  %v1823_v37 = vld [vmem:[#allocation6 + $0x304] ss:$16 sps:$4 sm:$0xff]   ;;  %p1976_p13 = por %p1975_p12, %p1974_p11 }
  0x5c   :  { %p1977_p0 = pnand %p1976_p13, %p1970_p10 }
  0x5d   :  { %890 = vmatpush1.bf16.msra.mxu0 %v1733_v38  ;;  %972 = vmatpush1.bf16.msra.mxu1 %v1734_v39  ;;  %v1826_v38 = vld [vmem:[#allocation6 + $0x30c] ss:$16 sps:$4 sm:$0xff]   ;;  %v1821_v39 = vld [vmem:[#allocation6 + $0x300] ss:$16 sps:$4 sm:$0xff]  }
  0x5e   :  { %891 = vmatprep.subr.bf16.mxu0 %v1735_v40  ;;  %973 = vmatprep.subr.bf16.mxu1 %v1737_v41  ;;  %v1824_v40 = vld [vmem:[#allocation6 + $0x308] ss:$16 sps:$4 sm:$0xff]   ;;  %v1829_v41 = vld [vmem:[#allocation6 + $0x324] ss:$16 sps:$4 sm:$0xff]  }
  0x61   :  { %892 = vmatpush1.bf16.msra.mxu0 %v1739_v42  ;;  %974 = vmatpush1.bf16.msra.mxu1 %v1740_v43  ;;  %v1832_v42 = vld [vmem:[#allocation6 + $0x32c] ss:$16 sps:$4 sm:$0xff]   ;;  %v1827_v43 = vld [vmem:[#allocation6 + $0x320] ss:$16 sps:$4 sm:$0xff]  }
  0x62   :  { %893 = vmatprep.subr.bf16.mxu0 %v1741_v44  ;;  %975 = vmatprep.subr.bf16.mxu1 %v1743_v45  ;;  %v1830_v44 = vld [vmem:[#allocation6 + $0x328] ss:$16 sps:$4 sm:$0xff]   ;;  %v1835_v45 = vld [vmem:[#allocation6 + $0x344] ss:$16 sps:$4 sm:$0xff]  }
  0x65   :  { %894 = vmatpush1.bf16.msra.mxu0 %v1745_v47  ;;  %976 = vmatpush1.bf16.msra.mxu1 %v1746_v49  ;;  %v1833_v47 = vld [vmem:[#allocation6 + $0x340] ss:$16 sps:$4 sm:$0xff]   ;;  %v1841_v49 = vld [vmem:[#allocation6 + $0x364] ss:$16 sps:$4 sm:$0xff]  }
  0x66   :  { %895 = vmatprep.subr.bf16.mxu0 %v1747_v50  ;;  %977 = vmatprep.subr.bf16.mxu1 %v1749_v51  ;;  %v1844_v50 = vld [vmem:[#allocation6 + $0x36c] ss:$16 sps:$4 sm:$0xff]   ;;  %v1839_v51 = vld [vmem:[#allocation6 + $0x360] ss:$16 sps:$4 sm:$0xff]  }
  0x69   :  { %896 = vmatpush1.bf16.msra.mxu0 %v1751_v52  ;;  %978 = vmatpush1.bf16.msra.mxu1 %v1752_v53  ;;  %v1842_v52 = vld [vmem:[#allocation6 + $0x368] ss:$16 sps:$4 sm:$0xff]   ;;  %v1847_v53 = vld [vmem:[#allocation6 + $0x384] ss:$16 sps:$4 sm:$0xff]  }
  0x6a   :  { %897 = vmatprep.subr.bf16.mxu0 %v1753_v54  ;;  %979 = vmatprep.subr.bf16.mxu1 %v1755_v55  ;;  %v1850_v54 = vld [vmem:[#allocation6 + $0x38c] ss:$16 sps:$4 sm:$0xff]   ;;  %v1845_v55 = vld [vmem:[#allocation6 + $0x380] ss:$16 sps:$4 sm:$0xff]  }
  0x6d   :  { %898 = vmatpush1.bf16.msra.mxu0 %v1757_v56  ;;  %980 = vmatpush1.bf16.msra.mxu1 %v1758_v57  ;;  %v1848_v56 = vld [vmem:[#allocation6 + $0x388] ss:$16 sps:$4 sm:$0xff]   ;;  %v1853_v57 = vld [vmem:[#allocation6 + $0x3a4] ss:$16 sps:$4 sm:$0xff]  }
  0x6e   :  { %899 = vmatprep.subr.bf16.mxu0 %v1759_v58  ;;  %981 = vmatprep.subr.bf16.mxu1 %v1761_v59  ;;  %v1856_v58 = vld [vmem:[#allocation6 + $0x3ac] ss:$16 sps:$4 sm:$0xff]   ;;  %v1851_v59 = vld [vmem:[#allocation6 + $0x3a0] ss:$16 sps:$4 sm:$0xff]  }
  0x71   :  { %900 = vmatpush1.bf16.msra.mxu0 %v1763_v60  ;;  %982 = vmatpush1.bf16.msra.mxu1 %v1764_v61  ;;  %v1854_v60 = vld [vmem:[#allocation6 + $0x3a8] ss:$16 sps:$4 sm:$0xff]   ;;  %v1859_v61 = vld [vmem:[#allocation6 + $0x3c4] ss:$16 sps:$4 sm:$0xff]  }
  0x72   :  { %901 = vmatprep.subr.bf16.mxu0 %v1765_v62  ;;  %983 = vmatprep.subr.bf16.mxu1 %v1767_v63  ;;  %v1862_v62 = vld [vmem:[#allocation6 + $0x3cc] ss:$16 sps:$4 sm:$0xff]   ;;  %v1857_v63 = vld [vmem:[#allocation6 + $0x3c0] ss:$16 sps:$4 sm:$0xff]  }
  0x75   :  { %902 = vmatpush1.bf16.msra.mxu0 %v1769_v0  ;;  %984 = vmatpush1.bf16.msra.mxu1 %v1770_v1  ;;  %v1860_v0 = vld [vmem:[#allocation6 + $0x3c8] ss:$16 sps:$4 sm:$0xff]   ;;  %v1865_v1 = vld [vmem:[#allocation6 + $0x3e4] ss:$16 sps:$4 sm:$0xff]  }
  0x76   :  { %912 = vmatprep.subr.bf16.mxu0 %v1775_v2  ;;  %994 = vmatprep.subr.bf16.mxu1 %v1778_v3  ;;  %v1868_v2 = vld [vmem:[#allocation6 + $0x3ec] ss:$16 sps:$4 sm:$0xff]   ;;  %v1863_v3 = vld [vmem:[#allocation6 + $0x3e0] ss:$16 sps:$4 sm:$0xff]  }
  0x78   :  { %904 = vmatmul.mubr.bf16.vlgmr.msra.gmra.mrb[0].mxu0 %v1434_v4  ;;  %986 = vmatmul.mubr.bf16.vlgmr.msra.gmra.mrb[0].mxu1 %v1434_v4  ;;  %v1866_v4 = vld [vmem:[#allocation6 + $0x3e8] ss:$16 sps:$4 sm:$0xff]  }
  0x79   :  { %913 = vmatpush1.bf16.msra.mxu0 %v1773_v5  ;;  %995 = vmatpush1.bf16.msra.mxu1 %v1776_v6  ;;  %v1871_v5 = vld [vmem:[#allocation8 + $0x40] sm:$0xff]  }
  0x7a   :  { %914 = vmatprep.subr.bf16.mxu0 %v1781_v7  ;;  %996 = vmatprep.subr.bf16.mxu1 %v1784_v8  ;;  %v1872_v6 = vld [vmem:[#allocation8 + $0xc0] sm:$0xff]   ;;  %v1436_v7 = vcombine.low %v2071_v29, %v2071_v29  ;;  %v1894_v29 = vld [vmem:[#allocation8 + $0xa8] sm:$0xff]  }
  0x7b   :  { %944 = vmatprep.mubr.bf16.mxu0 %v1437_v31  ;;  %1026 = vmatprep.mubr.bf16.mxu1 %v1437_v31  ;;  %v1873_v8 = vld [vmem:[#allocation8] sm:$0xff]   ;;  %v1896_v31 = vld [vmem:[#allocation8 + $0xf0] sm:$0xff]  }
  0x7d   :  { %915 = vmatpush1.bf16.msra.mxu0 %v1779_v9  ;;  %997 = vmatpush1.bf16.msra.mxu1 %v1782_v10  ;;  %v1874_v9 = vld [vmem:[#allocation8 + $0x80] sm:$0xff]   ;;  %v1875_v10 = vld [vmem:[#allocation8 + $0x48] sm:$0xff]  }
  0x7e   :  { %916 = vmatprep.subr.bf16.mxu0 %v1787_v11  ;;  %998 = vmatprep.subr.bf16.mxu1 %v1790_v12  ;;  %v1876_v11 = vld [vmem:[#allocation8 + $0xc8] sm:$0xff]  }
  0x7f   :  { %v1877_v12 = vld [vmem:[#allocation8 + $0x8] sm:$0xff]  }
  0x81   :  { %917 = vmatpush1.bf16.msra.mxu0 %v1785_v13  ;;  %999 = vmatpush1.bf16.msra.mxu1 %v1788_v14  ;;  %v1878_v13 = vld [vmem:[#allocation8 + $0x88] sm:$0xff]   ;;  %v1879_v14 = vld [vmem:[#allocation8 + $0x50] sm:$0xff]  }
  0x82   :  { %918 = vmatprep.subr.bf16.mxu0 %v1793_v15  ;;  %1000 = vmatprep.subr.bf16.mxu1 %v1796_v16  ;;  %v1880_v15 = vld [vmem:[#allocation8 + $0xd0] sm:$0xff]  }
  0x83   :  { %v1881_v16 = vld [vmem:[#allocation8 + $0x10] sm:$0xff]  }
  0x85   :  { %919 = vmatpush1.bf16.msra.mxu0 %v1791_v17  ;;  %1001 = vmatpush1.bf16.msra.mxu1 %v1794_v18  ;;  %v1882_v17 = vld [vmem:[#allocation8 + $0x90] sm:$0xff]   ;;  %v1883_v18 = vld [vmem:[#allocation8 + $0x58] sm:$0xff]  }
  0x86   :  { %920 = vmatprep.subr.bf16.mxu0 %v1799_v19  ;;  %1002 = vmatprep.subr.bf16.mxu1 %v1802_v20  ;;  %v1884_v19 = vld [vmem:[#allocation8 + $0xd8] sm:$0xff]  }
  0x87   :  { %v1885_v20 = vld [vmem:[#allocation8 + $0x18] sm:$0xff]  }
  0x89   :  { %921 = vmatpush1.bf16.msra.mxu0 %v1797_v21  ;;  %1003 = vmatpush1.bf16.msra.mxu1 %v1800_v22  ;;  %v1886_v21 = vld [vmem:[#allocation8 + $0x98] sm:$0xff]   ;;  %v1887_v22 = vld [vmem:[#allocation8 + $0x60] sm:$0xff]  }
  0x8a   :  { %922 = vmatprep.subr.bf16.mxu0 %v1805_v23  ;;  %1004 = vmatprep.subr.bf16.mxu1 %v1808_v24  ;;  %v1888_v23 = vld [vmem:[#allocation8 + $0xe0] sm:$0xff]  }
  0x8b   :  { %v1889_v24 = vld [vmem:[#allocation8 + $0x20] sm:$0xff]  }
  0x8d   :  { %923 = vmatpush1.bf16.msra.mxu0 %v1803_v25  ;;  %1005 = vmatpush1.bf16.msra.mxu1 %v1806_v26  ;;  %v1890_v25 = vld [vmem:[#allocation8 + $0xa0] sm:$0xff]   ;;  %v1891_v26 = vld [vmem:[#allocation8 + $0x68] sm:$0xff]  }
  0x8e   :  { %924 = vmatprep.subr.bf16.mxu0 %v1811_v27  ;;  %1006 = vmatprep.subr.bf16.mxu1 %v1814_v28  ;;  %v1892_v27 = vld [vmem:[#allocation8 + $0xe8] sm:$0xff]  }
  0x8f   :  { %v1893_v28 = vld [vmem:[#allocation8 + $0x28] sm:$0xff]  }
  0x91   :  { %925 = vmatpush1.bf16.msra.mxu0 %v1809_v30  ;;  %1007 = vmatpush1.bf16.msra.mxu1 %v1812_v32  ;;  %v1895_v30 = vld [vmem:[#allocation8 + $0x70] sm:$0xff]  }
  0x92   :  { %926 = vmatprep.subr.bf16.mxu0 %v1817_v33  ;;  %1008 = vmatprep.subr.bf16.mxu1 %v1820_v34  ;;  %v1897_v32 = vld [vmem:[#allocation8 + $0x30] sm:$0xff]   ;;  %v1899_v34 = vld [vmem:[#allocation8 + $0x78] sm:$0xff]  }
  0x93   :  { %v1898_v33 = vld [vmem:[#allocation8 + $0xb0] sm:$0xff]  }
  0x95   :  { %927 = vmatpush1.bf16.msra.mxu0 %v1815_v35  ;;  %1009 = vmatpush1.bf16.msra.mxu1 %v1818_v36  ;;  %v1900_v35 = vld [vmem:[#allocation8 + $0xf8] sm:$0xff]  }
  0x96   :  { %928 = vmatprep.subr.bf16.mxu0 %v1823_v37  ;;  %1010 = vmatprep.subr.bf16.mxu1 %v1826_v38  ;;  %v1901_v36 = vld [vmem:[#allocation8 + $0x38] sm:$0xff]   ;;  %v197_v38 = vlaneseq }
  0x97   :  { %v1902_v37 = vld [vmem:[#allocation8 + $0xb8] sm:$0xff]  }
  0x99   :  { %929 = vmatpush1.bf16.msra.mxu0 %v1821_v39  ;;  %1011 = vmatpush1.bf16.msra.mxu1 %v1824_v40  ;;  %v198_v39 = vshrl.u32 %v197_v38, 7 }
  0x9a   :  { %930 = vmatprep.subr.bf16.mxu0 %v1829_v41  ;;  %1012 = vmatprep.subr.bf16.mxu1 %v1832_v42  ;;  %v195_v42 = vld [vmem:[%s2097_s2] sm:$0xf] }
  0x9b   :  { %v199_v40 = vsub.s32 0, %v198_v39  ;;  %v207_v41 = vsub.s32 2, %v198_v39 }
  0x9d   :  { %931 = vmatpush1.bf16.msra.mxu0 %v1827_v43  ;;  %1013 = vmatpush1.bf16.msra.mxu1 %v1830_v44  ;;  %v203_v43 = vsub.s32 1, %v198_v39  ;;  %v211_v44 = vsub.s32 3, %v198_v39 }
  0x9e   :  { %932 = vmatprep.subr.bf16.mxu0 %v1835_v45  ;;  %1014 = vmatprep.subr.bf16.mxu1 %v1838_v46  ;;  %v200_v45 = vrot.slane %v195_v42, %v199_v40  ;;  %v208_v46 = vrot.slane %v195_v42, %v207_v41 }
  0xa1   :  { %933 = vmatpush1.bf16.msra.mxu0 %v1833_v47  ;;  %1015 = vmatpush1.bf16.msra.mxu1 %v1836_v48  ;;  %v204_v47 = vrot.slane %v195_v42, %v203_v43  ;;  %v212_v48 = vrot.slane %v195_v42, %v211_v44 }
  0xa2   :  { %934 = vmatprep.subr.bf16.mxu0 %v1841_v49  ;;  %1016 = vmatprep.subr.bf16.mxu1 %v1844_v50 }
  0xa5   :  { %935 = vmatpush1.bf16.msra.mxu0 %v1839_v51  ;;  %1017 = vmatpush1.bf16.msra.mxu1 %v1842_v52 }
  0xa6   :  { %936 = vmatprep.subr.bf16.mxu0 %v1847_v53  ;;  %1018 = vmatprep.subr.bf16.mxu1 %v1850_v54 }
  0xa9   :  { %937 = vmatpush1.bf16.msra.mxu0 %v1845_v55  ;;  %1019 = vmatpush1.bf16.msra.mxu1 %v1848_v56 }
  0xaa   :  { %938 = vmatprep.subr.bf16.mxu0 %v1853_v57  ;;  %1020 = vmatprep.subr.bf16.mxu1 %v1856_v58 }
  0xad   :  { %939 = vmatpush1.bf16.msra.mxu0 %v1851_v59  ;;  %1021 = vmatpush1.bf16.msra.mxu1 %v1854_v60 }
  0xae   :  { %940 = vmatprep.subr.bf16.mxu0 %v1859_v61  ;;  %1022 = vmatprep.subr.bf16.mxu1 %v1862_v62 }
  0xb1   :  { %941 = vmatpush1.bf16.msra.mxu0 %v1857_v63  ;;  %1023 = vmatpush1.bf16.msra.mxu1 %v1860_v0 }
  0xb2   :  { %942 = vmatprep.subr.bf16.mxu0 %v1865_v1  ;;  %1024 = vmatprep.subr.bf16.mxu1 %v1868_v2 }
  0xb5   :  { %943 = vmatpush1.bf16.msra.mxu0 %v1863_v3  ;;  %1025 = vmatpush1.bf16.msra.mxu1 %v1866_v4 }
  0xb6   :  { %1611 = vmatprep.subr.bf16.mxu0 %v1871_v5  ;;  %1633 = vmatprep.subr.bf16.mxu1 %v1872_v6 }
  0xb8   :  { %945 = vmatmul.mubr.bf16.vlgmr.msra.gmra.mrb[0].mxu0 %v1436_v7  ;;  %1027 = vmatmul.mubr.bf16.vlgmr.msra.gmra.mrb[0].mxu1 %v1436_v7  ;;  %v1568_v7 = vld [vmem:[%s2099_s4] ss:$0 sm:$0xff] }
  0xb9   :  { %1612 = vmatpush3.bf16.msra.mxu0 %v1873_v8  ;;  %1634 = vmatpush3.bf16.msra.mxu1 %v1874_v9 }
  0xba   :  { %1613 = vmatprep.subr.bf16.mxu0 %v1875_v10  ;;  %1635 = vmatprep.subr.bf16.mxu1 %v1876_v11 }
  0xbd   :  { %1614 = vmatpush3.bf16.msra.mxu0 %v1877_v12  ;;  %1636 = vmatpush3.bf16.msra.mxu1 %v1878_v13 }
  0xbe   :  { %1615 = vmatprep.subr.bf16.mxu0 %v1879_v14  ;;  %1637 = vmatprep.subr.bf16.mxu1 %v1880_v15 }
  0xc1   :  { %1616 = vmatpush3.bf16.msra.mxu0 %v1881_v16  ;;  %1638 = vmatpush3.bf16.msra.mxu1 %v1882_v17 }
  0xc2   :  { %1617 = vmatprep.subr.bf16.mxu0 %v1883_v18  ;;  %1639 = vmatprep.subr.bf16.mxu1 %v1884_v19 }
  0xc5   :  { %1618 = vmatpush3.bf16.msra.mxu0 %v1885_v20  ;;  %1640 = vmatpush3.bf16.msra.mxu1 %v1886_v21 }
  0xc6   :  { %1619 = vmatprep.subr.bf16.mxu0 %v1887_v22  ;;  %1641 = vmatprep.subr.bf16.mxu1 %v1888_v23 }
  0xc9   :  { %1620 = vmatpush3.bf16.msra.mxu0 %v1889_v24  ;;  %1642 = vmatpush3.bf16.msra.mxu1 %v1890_v25 }
  0xca   :  { %1621 = vmatprep.subr.bf16.mxu0 %v1891_v26  ;;  %1643 = vmatprep.subr.bf16.mxu1 %v1892_v27 }
  0xcd   :  { %1622 = vmatpush3.bf16.msra.mxu0 %v1893_v28  ;;  %1644 = vmatpush3.bf16.msra.mxu1 %v1894_v29 }
  0xce   :  { %1623 = vmatprep.subr.bf16.mxu0 %v1895_v30  ;;  %1645 = vmatprep.subr.bf16.mxu1 %v1896_v31 }
  0xd1   :  { %1624 = vmatpush3.bf16.msra.mxu0 %v1897_v32  ;;  %1646 = vmatpush3.bf16.msra.mxu1 %v1898_v33 }
  0xd2   :  { %1625 = vmatprep.subr.bf16.mxu0 %v1899_v34  ;;  %1647 = vmatprep.subr.bf16.mxu1 %v1900_v35 }
  0xd5   :  { %1626 = vmatpush3.bf16.msra.mxu0 %v1901_v36  ;;  %1648 = vmatpush3.bf16.msra.mxu1 %v1902_v37 }
 0x18b   :  { %v946_v49 = vpop.f32.mrb[0].mxu0  ;;  %v1028_v50 = vpop.f32.mrb[0].mxu1 }
 0x18c   :  { %v1655_v51 = vadd.f32 %v946_v49, %v200_v45  ;;  %v1657_v52 = vadd.f32 %v1028_v50, %v208_v46  ;;  %v948_v53 = vpop.f32.mrb[1].mxu0  ;;  %v1030_v54 = vpop.f32.mrb[1].mxu1 }
 0x18d   :  { %v1656_v55 = vadd.f32 %v948_v53, %v204_v47  ;;  %v1658_v56 = vadd.f32 %v1030_v54, %v212_v48  ;;  %v950_v57 = vpop.f32.mrb[2].mxu0  ;;  %v1032_v58 = vpop.f32.mrb[2].mxu1 }
 0x18e   :  { %v1035_v59 = vmax.f32 %v1655_v51, 0.0  ;;  %v1037_v60 = vmax.f32 %v1657_v52, 0.0  ;;  %v951_v61 = vpop.f32.mrb[3].mxu0  ;;  %v1033_v62 = vpop.f32.mrb[3].mxu1 }
 0x18f   :  { %v1036_v63 = vmax.f32 %v1656_v55, 0.0  ;;  %v1038_v0 = vmax.f32 %v1658_v56, 0.0 }
 0x190   :  { %v1607_v3 = vpack.c.bf16 %v1035_v59, %v1035_v59  ;;  %v1609_v4 = vpack.c.bf16 %v1037_v60, %v1037_v60 }
 0x191   :  { %v1608_v1 = vpack.c.bf16 %v1036_v63, %v1036_v63  ;;  %v1610_v2 = vpack.c.bf16 %v1038_v0, %v1038_v0 }
 0x193   :  { %1368 = vmatprep.mubr.bf16.mxu0 %v1608_v1  ;;  %1408 = vmatprep.mubr.bf16.mxu1 %v1610_v2 }
 0x194   :  { %1369 = vmatmul.mubr.bf16.vlgmr.msra.gmra.mrb[4].mxu0 %v1607_v3  ;;  %1409 = vmatmul.mubr.bf16.vlgmr.msra.gmra.mrb[4].mxu1 %v1609_v4 }
 0x267   :  { %v1627_v5 = vpop.f32.mrb[4].mxu0  ;;  %v1649_v6 = vpop.f32.mrb[4].mxu1 }
 0x268   :  { %v1628_v8 = vpop.f32.mrb[5].mxu0  ;;  %v1650_v9 = vpop.f32.mrb[5].mxu1 }
 0x269   :  { %v1629_v10 = vadd.f32 %v1628_v8, %v1627_v5  ;;  %v1651_v11 = vadd.f32 %v1650_v9, %v1649_v6  ;;  %v1630_v12 = vpop.f32.mrb[6].mxu0  ;;  %v1652_v13 = vpop.f32.mrb[6].mxu1 }
 0x26a   :  { %v1631_v14 = vpop.f32.mrb[7].mxu0  ;;  %v1653_v15 = vpop.f32.mrb[7].mxu1 }
 0x26b   :  { %v1371_v16 = vadd.f32 %v1629_v10, %v1568_v7 }
 0x26d   :  { %v1411_v17 = vadd.f32 %v1651_v11, %v1371_v16 }
 0x26f   :  { %v1416_v18 = vmax.f32 %v1411_v17, 0.0 }
 0x271   :  { %1417 = vst [vmem:[#allocation9] sm:$0xff] %v1416_v18 }
 0x272   :  { %1980 = shalt.err (!%p1977_p0)
}
 0x273   :  { %s1981_s12 = scalar_lea.hbm %s2100_s5, 128 }
 0x274   :  { %p1982_p1 = scmp.ne.s32.totalorder %s2100_s5, %s1981_s12  ;;  %p1985_p2 = scmp.lt.u32.totalorder %s1981_s12, %s2100_s5 }
 0x276   :  { %p1987_p3 = pnand %p1985_p2, %p1982_p1 }
 0x278   :  { %1990 = shalt.err (!%p1987_p3)
}
 0x279   :  { %1427 = dma.vmem_to_hbm [thread:$0]  %s1425_s9, 128, %s2100_s5, [#allocation5]  }
 0x27a   :  { %1995 = dma.done.wait [#allocation5], 128  }
 0x27b   :  { %1996 = vsyncadd [#allocation5], 4294967168 }
 0x27c   :  { %1431 = vsyncpa [#allocation4], 1 }
 0x27d   :  { %1432 = vsyncpa [#allocation7], 1 }
 0x27e   :  { %1433 = vsyncpa [#allocation5], 1 }

</bundles_post_ra>
